<compile_context>
chip_gen: v7x
topology: tpu7x:2x2x1
jax: 0.10.0
libtpu: 0.0.40
codegen_flags: <defaults>
</compile_context>

<pallas_src>
import functools

import jax
import jax.numpy as jnp
from jax.experimental import pallas as pl
from jax.experimental.pallas import tpu as pltpu


# ----------------------------------------------------------------------------- activations
def _apply_act(y, act_type):
    if act_type is None:
        return y
    if act_type == "relu":
        return jnp.maximum(y, 0.0)
    if act_type == "lrelu":          # PyTorch LeakyReLU(0.1)
        return jnp.where(y >= 0.0, y, 0.1 * y)
    if act_type == "silu":
        return y * jax.nn.sigmoid(y)
    if act_type == "mish":
        return y * jnp.tanh(jax.nn.softplus(y))
    if act_type == "gelu":           # tanh approximation (TPU-friendly)
        return jax.nn.gelu(y, approximate=True)
    raise NotImplementedError(act_type)


# ----------------------------------------------------------------------------- kernel
def _conv_taps(x2d, w_ref, xpad_ref, *, H, W, K, pad):
    """KxK, stride-1, 'same'-padded conv of a flat (H*W, Cin) tile.

    Implemented as K*K shifted matmuls over a zero-padded flat VMEM scratch:
    output flat position m needs input flat position m + (dy-pad)*W + (dx-pad),
    so each tap is a contiguous 2-D slice (no reshapes, no window copies).
    Column wrap at the image edge is masked on the VPU. Accumulates in f32.
    """
    HW = H * W
    Cout = w_ref.shape[-1]

    if K == 1:                                   # 1x1 conv: a single matmul
        return jnp.dot(x2d, w_ref[0], preferred_element_type=jnp.float32)

    off = pad * (W + 1)                          # zero slop before/after the image
    xpad_ref[...] = jnp.zeros(xpad_ref.shape, xpad_ref.dtype)
    xpad_ref[pl.ds(off, HW), :] = x2d

    # Column index of every flat output position (for left/right edge masking).
    col = jax.lax.broadcasted_iota(jnp.int32, (HW, 1), 0) % W

    acc = jnp.zeros((HW, Cout), jnp.float32)
    for dy in range(K):
        for dx in range(K):
            start = off + (dy - pad) * W + (dx - pad)        # static, >= 0
            xs = xpad_ref[pl.ds(start, HW), :]
            shift = dx - pad
            if shift != 0:
                valid = jnp.logical_and(col + shift >= 0, col + shift < W)
                xs = jnp.where(valid, xs, 0.0)
            acc = acc + jnp.dot(xs, w_ref[dy * K + dx],
                                preferred_element_type=jnp.float32)
    return acc


def _basic_conv_kernel(x_ref, *rest, H, W, K, pad, act_type, n_stages):
    """rest = (w_0, b_0, ..., w_{n-1}, b_{n-1}, o_ref[, xpad_scratch])."""
    wb = rest[: 2 * n_stages]
    o_ref = rest[2 * n_stages]
    scratch = rest[2 * n_stages + 1:]
    xpad_ref = scratch[0] if scratch else None

    h = x_ref[0]                                              # (H*W, Cin), compute dtype
    for s in range(n_stages):
        w_ref, b_ref = wb[2 * s], wb[2 * s + 1]
        acc = _conv_taps(h, w_ref, xpad_ref, H=H, W=W, K=K, pad=pad)
        acc = acc + b_ref[...]                                # folded BN bias (f32)
        if s == n_stages - 1:
            h = _apply_act(acc, act_type)                     # activation only on last stage
        else:
            h = acc.astype(x_ref.dtype)                       # keep intermediate in VMEM/regs
    o_ref[0] = h.astype(o_ref.dtype)


# ----------------------------------------------------------------------------- wrapper
def _fused_basic_conv(x_flat, stages, *, H, W, K, pad, act_type, compute_dtype):
    """x_flat: (N, H*W, Cin). stages: list of (w_taps (K*K,Cin_s,Cout_s) f32, bias (1,Cout_s) f32)."""
    N, HW, Cin = x_flat.shape
    Cout = stages[-1][0].shape[-1]
    out_dtype = x_flat.dtype

    inputs = [x_flat.astype(compute_dtype)]
    in_specs = [pl.BlockSpec((1, HW, Cin), lambda n: (n, 0, 0))]
    for w_taps, bias in stages:
        # Every stage's input channel count equals Cin (true for BasicConv), so
        # the single halo scratch below can be shared between stages.
        assert w_taps.shape[-2] == Cin
        cin_s, cout_s = w_taps.shape[-2], w_taps.shape[-1]
        inputs.append(w_taps.astype(compute_dtype))
        inputs.append(bias)  # stays f32 (added to the f32 accumulator)
        # Constant index maps -> weights/bias stay resident in VMEM across the grid.
        in_specs.append(pl.BlockSpec((K * K, cin_s, cout_s), lambda n: (0, 0, 0)))
        in_specs.append(pl.BlockSpec((1, cout_s), lambda n: (0, 0)))

    scratch_shapes = []
    if K > 1:
        s_len = -(-(HW + 2 * pad * (W + 1)) // 8) * 8         # flat image + zero halo, /8 rounded
        scratch_shapes.append(pltpu.VMEM((s_len, Cin), compute_dtype))

    kernel = functools.partial(_basic_conv_kernel, H=H, W=W, K=K, pad=pad,
                               act_type=act_type, n_stages=len(stages))

    return pl.pallas_call(
        kernel,
        out_shape=jax.ShapeDtypeStruct((N, HW, Cout), out_dtype),
        grid_spec=pltpu.PrefetchScalarGridSpec(
            num_scalar_prefetch=0,
            grid=(N,),
            in_specs=in_specs,
            out_specs=pl.BlockSpec((1, HW, Cout), lambda n: (n, 0, 0)),
            scratch_shapes=scratch_shapes,
        ),
        compiler_params=pltpu.CompilerParams(
            dimension_semantics=("parallel",),
            vmem_limit_bytes=48 * 1024 * 1024,
        ),
    )(*inputs)


def _fold_conv_bn(w_oihw, bn, conv_bias, eps=1e-5):
    """Fold inference BatchNorm into the conv weights (f32). Returns (w_taps, bias2d)."""
    cout, cin, k, _ = w_oihw.shape
    if bn is not None:
        gamma, beta, mean, var = bn
        scale = gamma / jnp.sqrt(var + eps)
        bias = beta - mean * scale
        if conv_bias is not None:
            bias = bias + conv_bias * scale
    else:
        scale = jnp.ones((cout,), jnp.float32)
        bias = conv_bias if conv_bias is not None else jnp.zeros((cout,), jnp.float32)
    w_hwio = jnp.transpose(w_oihw, (2, 3, 1, 0)).astype(jnp.float32) * scale[None, None, None, :]
    return w_hwio.reshape(k * k, cin, cout), bias.reshape(1, cout).astype(jnp.float32)


def basic_conv_forward(x_nchw, params, *, compute_dtype=jnp.float32):
    """Input/output are NCHW to match the PyTorch module (NHWC is used internally).

    In a full NHWC network the boundary transposes below would be hoisted to the
    model boundary and disappear from the per-block cost.
    """
    cfg = params["cfg"]
    K, pad, stride = cfg["kernel_size"], cfg["padding"], cfg["stride"]
    if stride != 1 or 2 * pad != K - 1:
        # TODO(synk): strided / non-'same'-padded convs not implemented.
        raise NotImplementedError("only stride=1 and 'same'-style padding (2p == k-1) supported")

    N, Cin, H, W = x_nchw.shape
    # NCHW -> NHWC (lane dim = channels), then flatten spatial to one sublane axis.
    x_flat = jnp.transpose(x_nchw, (0, 2, 3, 1)).reshape(N, H * W, Cin)

    if not cfg["depthwise"]:
        stages = [_fold_conv_bn(params["w"], params["bn"], params["conv_bias"])]
    else:
        stages = [_fold_conv_bn(params["w1"], params["bn1"], params["conv1_bias"]),
                  _fold_conv_bn(params["w2"], params["bn2"], params["conv2_bias"])]
    Cout = stages[-1][0].shape[-1]

    out = _fused_basic_conv(x_flat, stages, H=H, W=W, K=K, pad=pad,
                            act_type=cfg["act_type"], compute_dtype=compute_dtype)
    return jnp.transpose(out.reshape(N, H, W, Cout), (0, 3, 1, 2))


# ----------------------------------------------------------------------------- params & reference
def init_basic_conv_params(key, in_dim, out_dim, kernel_size=1, padding=0, stride=1,
                           act_type="lrelu", norm_type="BN", depthwise=False):
    if norm_type not in ("BN", None):
        raise NotImplementedError("TODO(synk): GroupNorm ('GN') not implemented")
    add_bias = norm_type is None
    cfg = dict(kernel_size=kernel_size, padding=padding, stride=stride,
               act_type=act_type, norm_type=norm_type, depthwise=depthwise)

    def make_bn(k, dim):
        kg, kb, km, kv = jax.random.split(k, 4)
        return (1.0 + 0.1 * jax.random.normal(kg, (dim,), jnp.float32),
                0.1 * jax.random.normal(kb, (dim,), jnp.float32),
                0.1 * jax.random.normal(km, (dim,), jnp.float32),
                jnp.abs(jax.random.normal(kv, (dim,), jnp.float32)) + 0.5)

    def make_conv(k, cin, cout):
        kw, kb = jax.random.split(k)
        w = 0.1 * jax.random.normal(kw, (cout, cin, kernel_size, kernel_size), jnp.float32)
        b = 0.1 * jax.random.normal(kb, (cout,), jnp.float32) if add_bias else None
        return w, b

    params = {"cfg": cfg}
    if not depthwise:
        kc, kn = jax.random.split(key)
        w, b = make_conv(kc, in_dim, out_dim)
        params.update(w=w, conv_bias=b,
                      bn=make_bn(kn, out_dim) if norm_type == "BN" else None)
    else:
        kc1, kn1, kc2, kn2 = jax.random.split(key, 4)
        w1, b1 = make_conv(kc1, in_dim, in_dim)
        w2, b2 = make_conv(kc2, in_dim, out_dim)
        params.update(w1=w1, conv1_bias=b1,
                      bn1=make_bn(kn1, in_dim) if norm_type == "BN" else None,
                      w2=w2, conv2_bias=b2,
                      bn2=make_bn(kn2, out_dim) if norm_type == "BN" else None)
    return params


def _reference_forward(x_nchw, params):
    """Pure-JAX reference (lax conv) for correctness checks."""
    cfg = params["cfg"]
    k, p, s = cfg["kernel_size"], cfg["padding"], cfg["stride"]

    def conv(x, w, b):
        y = jax.lax.conv_general_dilated(
            x, w, window_strides=(s, s), padding=[(p, p), (p, p)],
            dimension_numbers=("NCHW", "OIHW", "NCHW"))
        return y if b is None else y + b[None, :, None, None]

    def bn(x, bn_params):
        if bn_params is None:
            return x
        gamma, beta, mean, var = bn_params
        inv = gamma / jnp.sqrt(var + 1e-5)
        return x * inv[None, :, None, None] + (beta - mean * inv)[None, :, None, None]

    if not cfg["depthwise"]:
        y = bn(conv(x_nchw, params["w"], params["conv_bias"]), params["bn"])
        return _apply_act(y, cfg["act_type"])
    y = bn(conv(x_nchw, params["w1"], params["conv1_bias"]), params["bn1"])
    y = bn(conv(y, params["w2"], params["conv2_bias"]), params["bn2"])
    return _apply_act(y, cfg["act_type"])


# ----------------------------------------------------------------------------- demo / self-test
if __name__ == "__main__":
    key = jax.random.PRNGKey(0)
    kx, k1, k2, k3 = jax.random.split(key, 4)

    N, C, H, W = 2, 4, 16, 16
    x = jax.random.normal(kx, (N, C, H, W), jnp.float32)

    # 1) default BasicConv(4, 8): 1x1 conv + BN + LeakyReLU(0.1), f32.
    p1 = init_basic_conv_params(k1, in_dim=C, out_dim=8)
    o1 = basic_conv_forward(x, p1)
    jax.block_until_ready(o1)
    r1 = _reference_forward(x, p1)
    assert o1.shape == (N, 8, H, W)
    assert jnp.allclose(o1, r1, atol=1e-4, rtol=1e-4), "mismatch (1x1 / lrelu)"

    # 2) BasicConv(4, 8, k=3, p=1, act='silu'): fused 3x3 conv + BN + SiLU, f32.
    p2 = init_basic_conv_params(k2, in_dim=C, out_dim=8, kernel_size=3, padding=1,
                                act_type="silu")
    o2 = basic_conv_forward(x, p2)
    jax.block_until_ready(o2)
    r2 = _reference_forward(x, p2)
    assert jnp.allclose(o2, r2, atol=1e-4, rtol=1e-4), "mismatch (3x3 / silu)"

    # 3) depthwise branch (two convs + two BNs + SiLU fused into ONE kernel), bf16 compute.
    p3 = init_basic_conv_params(k3, in_dim=C, out_dim=8, kernel_size=3, padding=1,
                                act_type="silu", depthwise=True)
    o3 = basic_conv_forward(x, p3, compute_dtype=jnp.bfloat16)
    jax.block_until_ready(o3)
    r3 = _reference_forward(x, p3)
    assert jnp.allclose(o3, r3, atol=5e-2, rtol=5e-2), "mismatch (depthwise / bf16)"

    print("KERNEL_OK")
</pallas_src>

<mosaic_0001>
module attributes {stable_mosaic.version = 11 : i64} {
  func.func @_basic_conv_kernel(%arg0: i32, %arg1: memref<1x256x4xf32, #tpu.memory_space<vmem>>, %arg2: memref<1x4x8xf32, #tpu.memory_space<vmem>>, %arg3: memref<1x8xf32, #tpu.memory_space<vmem>>, %arg4: memref<1x256x8xf32, #tpu.memory_space<vmem>>) attributes {dimension_semantics = [#tpu.dimension_semantics<parallel>], iteration_bounds = array<i64: 2>, scalar_prefetch = 0 : i64, scratch_operands = 0 : i64, tpu.core_type = #tpu.core_type<tc>, window_params = [{transform_indices = @transform_0, window_bounds = array<i64: 1, 256, 4>}, {pipeline_mode = #tpu.pipeline_mode<synchronous>, transform_indices = @transform_1, window_bounds = array<i64: 1, 4, 8>}, {pipeline_mode = #tpu.pipeline_mode<synchronous>, transform_indices = @transform_2, window_bounds = array<i64: 1, 8>}, {transform_indices = @transform_3, window_bounds = array<i64: 1, 256, 8>}]} {
    %c0 = arith.constant 0 : index
    %c0_0 = arith.constant 0 : index
    %c0_1 = arith.constant 0 : index
    %0 = vector.load %arg1[%c0, %c0_0, %c0_1] : memref<1x256x4xf32, #tpu.memory_space<vmem>>, vector<1x256x4xf32>
    %1 = vector.shape_cast %0 : vector<1x256x4xf32> to vector<256x4xf32>
    %c0_2 = arith.constant 0 : index
    %c0_3 = arith.constant 0 : index
    %c0_4 = arith.constant 0 : index
    %2 = vector.load %arg2[%c0_2, %c0_3, %c0_4] : memref<1x4x8xf32, #tpu.memory_space<vmem>>, vector<1x4x8xf32>
    %3 = vector.shape_cast %2 : vector<1x4x8xf32> to vector<4x8xf32>
    %cst = arith.constant dense<0.000000e+00> : vector<256x8xf32>
    %4 = tpu.matmul %1, %3, %cst {dimension_numbers = #tpu.dot_dimension_numbers<[1], [0], [0], [1], [0, 0, 1, 1], [], []>} : vector<256x4xf32>, vector<4x8xf32>, vector<256x8xf32> -> vector<256x8xf32>
    %c0_5 = arith.constant 0 : index
    %c0_6 = arith.constant 0 : index
    %5 = vector.load %arg3[%c0_5, %c0_6] : memref<1x8xf32, #tpu.memory_space<vmem>>, vector<1x8xf32>
    %6 = vector.broadcast %5 : vector<1x8xf32> to vector<256x8xf32>
    %7 = arith.addf %4, %6 : vector<256x8xf32>
    %cst_7 = arith.constant 0.000000e+00 : f32
    %8 = vector.broadcast %cst_7 : f32 to vector<256x8xf32>
    %9 = arith.cmpf oge, %7, %8 : vector<256x8xf32>
    %cst_8 = arith.constant 1.000000e-01 : f32
    %10 = vector.broadcast %cst_8 : f32 to vector<256x8xf32>
    %11 = arith.mulf %10, %7 : vector<256x8xf32>
    %12 = arith.select %9, %7, %11 : vector<256x8xi1>, vector<256x8xf32>
    %c0_9 = arith.constant 0 : index
    %c0_10 = arith.constant 0 : index
    %c0_11 = arith.constant 0 : index
    %13 = vector.load %arg4[%c0_9, %c0_10, %c0_11] : memref<1x256x8xf32, #tpu.memory_space<vmem>>, vector<1x256x8xf32>
    %14 = vector.shape_cast %13 : vector<1x256x8xf32> to vector<256x8xf32>
    %15 = vector.shape_cast %12 : vector<256x8xf32> to vector<1x256x8xf32>
    tpu.vector_store %arg4[%c0_9, %c0_10, %c0_11], %15 {strides = array<i32>} : memref<1x256x8xf32, #tpu.memory_space<vmem>>, vector<1x256x8xf32>,
    return
  }
  func.func @transform_0(%arg0: i32) -> (i32, i32, i32) {
    %c0_i32 = arith.constant 0 : i32
    %c0_i32_0 = arith.constant 0 : i32
    %c0_i32_1 = arith.constant 0 : i32
    return %arg0, %c0_i32, %c0_i32_0 : i32, i32, i32
  }
  func.func @transform_1(%arg0: i32) -> (i32, i32, i32) {
    %c0_i32 = arith.constant 0 : i32
    %c0_i32_0 = arith.constant 0 : i32
    %c0_i32_1 = arith.constant 0 : i32
    %c0_i32_2 = arith.constant 0 : i32
    return %c0_i32, %c0_i32_0, %c0_i32_1 : i32, i32, i32
  }
  func.func @transform_2(%arg0: i32) -> (i32, i32) {
    %c0_i32 = arith.constant 0 : i32
    %c0_i32_0 = arith.constant 0 : i32
    %c0_i32_1 = arith.constant 0 : i32
    return %c0_i32, %c0_i32_0 : i32, i32
  }
  func.func @transform_3(%arg0: i32) -> (i32, i32, i32) {
    %c0_i32 = arith.constant 0 : i32
    %c0_i32_0 = arith.constant 0 : i32
    %c0_i32_1 = arith.constant 0 : i32
    return %arg0, %c0_i32, %c0_i32_0 : i32, i32, i32
  }
}

</mosaic_0001>

<bundles_post_ra>
// kernel: tpu_custom_call.1
= control target key start
LH: loop header
LB: loop body
LE: loop exit
PB: predicated region body
PF: predicated region fallthrough
CT: control target
= control target key end

     0   :  { %s889_s12 = smov 0   ;;  %s1085_s0 = inlined_call_operand.vmem [shape: f32[2,256,4], index: 0, kind: input, shape index: {}]   ;;  %s1086_s1 = inlined_call_operand.vmem [shape: f32[1,4,8], index: 1, kind: input, shape index: {}]   ;;  %s1087_s2 = inlined_call_operand.vmem [shape: f32[1,8], index: 2, kind: input, shape index: {}]   ;;  %s1088_s3 = inlined_call_operand.vmem [shape: f32[2,256,8], index: 3, kind: output, shape index: {}]  }
   0x1 LB: > { %s721_s13 = sadd.s32 4294967295, %s867_s12   ;;  %p725_p0 = scmp.ge.s32.totalorder %s867_s12, 1  ;;  %s867_s12 = sphi %s889_s12, %s13_s12  }
   0x2   : > { %p137_p1 = scmp.lt.s32.totalorder %s867_s12, 3 }
   0x4   : > { %p138_p2 = pnand %p725_p0, %p137_p1 }
   0x5   : > { %v203_v0 = vld [vmem:[%s1086_s1] sm:$0xf] (!%p138_p2)  ;;  %vm308_vm0 = vcmask (!%p138_p2), 1043456   ;;  %p161_p3 = scmp.lt.s32.totalorder (!%p138_p2), %s721_s13, 1  ;;  %vm211_vm1 = vcmask (!%p138_p2), 31744   ;;  %vm633_vm2 = vcmask (!%p138_p2), 64512  }
   0x6   : > { %141 = sbr.rel (%p138_p2) target bundleno = 268 (0x10c), region = 32  ;;  %801 = vmatprep.subr.msk.mxu0 (!%p138_p2), %vm308_vm0, %v203_v0  ;;  %851 = vmatprep.subr.msk.mxu1 (!%p138_p2), %vm308_vm0, %v203_v0  ;;  %v977_v33 = vld [vmem:[%s1087_s2] ss:$0 sm:$0xff] (!%p138_p2) }
   0x7   : > { %802 = vmatpush3.msk.msra.mxu0 (!%p138_p2), %vm308_vm0, %v203_v0  ;;  %852 = vmatpush3.msk.msra.mxu1 (!%p138_p2), %vm308_vm0, %v203_v0 }
   0xd   : > { %s1090_s13 = smov (!%p161_p3, %s721_s13), 1 }
   0xe   : > { %s766_s16 = sshll.u32 %s1090_s13, 8 }
   0xf   : > { %s908_s19 = scalar_lea.vmem %s1085_s0, %s766_s16  ;;  %s988_s24 = scalar_lea.vmem %s1088_s3, %s766_s16 }
  0x10   : > { %v171_v1 = vld [vmem:[%s908_s19] sm:$0xff]  ;;  %v172_v3 = vld [vmem:[%s908_s19 + $0x8] sm:$0xff]  ;;  %v173_v5 = vld [vmem:[%s908_s19 + $0x10] sm:$0xff] }
  0x11   : > { %v187_v2 = vld [vmem:[%s908_s19 + $0x80] sm:$0xff]  ;;  %803 = vmatprep.mubr.msk.f32.mxu0 %vm211_vm1, %v171_v1  ;;  %v188_v4 = vld [vmem:[%s908_s19 + $0x88] sm:$0xff]  ;;  %v189_v6 = vld [vmem:[%s908_s19 + $0x90] sm:$0xff] }
  0x12   : > { %827 = vmatprep.mubr.msk.f32.mxu1 %vm211_vm1, %v187_v2  ;;  %804 = vmatmul.mubr.msk.f32.vlgmr.msra.gmra.mrb[0].mxu0 %vm211_vm1, %v172_v3  ;;  %v174_v7 = vld [vmem:[%s908_s19 + $0x18] sm:$0xff]  ;;  %v175_v9 = vld [vmem:[%s908_s19 + $0x20] sm:$0xff]  ;;  %v176_v11 = vld [vmem:[%s908_s19 + $0x28] sm:$0xff] }
  0x13   : > { %828 = vmatmul.mubr.msk.f32.vlgmr.msra.gmra.mrb[0].mxu1 %vm211_vm1, %v188_v4  ;;  %806 = vmatprep.mubr.msk.f32.mxu0 %vm211_vm1, %v173_v5  ;;  %v190_v8 = vld [vmem:[%s908_s19 + $0x98] sm:$0xff]  ;;  %v191_v10 = vld [vmem:[%s908_s19 + $0xa0] sm:$0xff]  ;;  %v192_v12 = vld [vmem:[%s908_s19 + $0xa8] sm:$0xff] }
  0x14   : > { %830 = vmatprep.mubr.msk.f32.mxu1 %vm211_vm1, %v189_v6  ;;  %v177_v13 = vld [vmem:[%s908_s19 + $0x30] sm:$0xff]  ;;  %v178_v15 = vld [vmem:[%s908_s19 + $0x38] sm:$0xff]  ;;  %v179_v17 = vld [vmem:[%s908_s19 + $0x40] sm:$0xff] }
  0x15   : > { %v193_v14 = vld [vmem:[%s908_s19 + $0xb0] sm:$0xff]  ;;  %v194_v16 = vld [vmem:[%s908_s19 + $0xb8] sm:$0xff]  ;;  %v195_v18 = vld [vmem:[%s908_s19 + $0xc0] sm:$0xff] }
  0x16   : > { %807 = vmatmul.mubr.msk.f32.gmra.mrb[2].mxu0 %vm211_vm1, %v174_v7  ;;  %v180_v19 = vld [vmem:[%s908_s19 + $0x48] sm:$0xff]  ;;  %v181_v21 = vld [vmem:[%s908_s19 + $0x50] sm:$0xff]  ;;  %v182_v23 = vld [vmem:[%s908_s19 + $0x58] sm:$0xff] }
  0x17   : > { %831 = vmatmul.mubr.msk.f32.gmra.mrb[2].mxu1 %vm211_vm1, %v190_v8  ;;  %809 = vmatprep.mubr.msk.f32.mxu0 %vm211_vm1, %v175_v9  ;;  %v196_v20 = vld [vmem:[%s908_s19 + $0xc8] sm:$0xff]  ;;  %v197_v22 = vld [vmem:[%s908_s19 + $0xd0] sm:$0xff]  ;;  %v198_v24 = vld [vmem:[%s908_s19 + $0xd8] sm:$0xff] }
  0x18   : > { %833 = vmatprep.mubr.msk.f32.mxu1 %vm211_vm1, %v191_v10  ;;  %v183_v25 = vld [vmem:[%s908_s19 + $0x60] sm:$0xff]  ;;  %v184_v27 = vld [vmem:[%s908_s19 + $0x68] sm:$0xff]  ;;  %v185_v29 = vld [vmem:[%s908_s19 + $0x70] sm:$0xff] }
  0x19   : > { %v199_v26 = vld [vmem:[%s908_s19 + $0xe0] sm:$0xff]  ;;  %v200_v28 = vld [vmem:[%s908_s19 + $0xe8] sm:$0xff]  ;;  %v201_v30 = vld [vmem:[%s908_s19 + $0xf0] sm:$0xff] }
  0x1a   : > { %810 = vmatmul.mubr.msk.f32.gmra.mrb[4].mxu0 %vm211_vm1, %v176_v11  ;;  %v186_v31 = vld [vmem:[%s908_s19 + $0x78] sm:$0xff] }
  0x1b   : > { %834 = vmatmul.mubr.msk.f32.gmra.mrb[4].mxu1 %vm211_vm1, %v192_v12  ;;  %812 = vmatprep.mubr.msk.f32.mxu0 %vm211_vm1, %v177_v13  ;;  %v202_v32 = vld [vmem:[%s908_s19 + $0xf8] sm:$0xff] }
  0x1c   : > { %836 = vmatprep.mubr.msk.f32.mxu1 %vm211_vm1, %v193_v14 }
  0x1e   : > { %813 = vmatmul.mubr.msk.f32.gmra.mrb[6].mxu0 %vm211_vm1, %v178_v15 }
  0x1f   : > { %837 = vmatmul.mubr.msk.f32.gmra.mrb[6].mxu1 %vm211_vm1, %v194_v16  ;;  %815 = vmatprep.mubr.msk.f32.mxu0 %vm211_vm1, %v179_v17 }
  0x20   : > { %839 = vmatprep.mubr.msk.f32.mxu1 %vm211_vm1, %v195_v18 }
  0x22   : > { %816 = vmatmul.mubr.msk.f32.gmra.mrb[8].mxu0 %vm211_vm1, %v180_v19 }
  0x23   : > { %840 = vmatmul.mubr.msk.f32.gmra.mrb[8].mxu1 %vm211_vm1, %v196_v20  ;;  %818 = vmatprep.mubr.msk.f32.mxu0 %vm211_vm1, %v181_v21 }
  0x24   : > { %842 = vmatprep.mubr.msk.f32.mxu1 %vm211_vm1, %v197_v22 }
  0x26   : > { %819 = vmatmul.mubr.msk.f32.gmra.mrb[10].mxu0 %vm211_vm1, %v182_v23 }
  0x27   : > { %843 = vmatmul.mubr.msk.f32.gmra.mrb[10].mxu1 %vm211_vm1, %v198_v24  ;;  %821 = vmatprep.mubr.msk.f32.mxu0 %vm211_vm1, %v183_v25 }
  0x28   : > { %845 = vmatprep.mubr.msk.f32.mxu1 %vm211_vm1, %v199_v26 }
  0x2a   : > { %822 = vmatmul.mubr.msk.f32.gmra.mrb[12].mxu0 %vm211_vm1, %v184_v27 }
  0x2b   : > { %846 = vmatmul.mubr.msk.f32.gmra.mrb[12].mxu1 %vm211_vm1, %v200_v28  ;;  %824 = vmatprep.mubr.msk.f32.mxu0 %vm211_vm1, %v185_v29 }
  0x2c   : > { %848 = vmatprep.mubr.msk.f32.mxu1 %vm211_vm1, %v201_v30 }
  0x2e   : > { %825 = vmatmul.mubr.msk.f32.gmra.mrb[14].mxu0 %vm211_vm1, %v186_v31 }
  0x2f   : > { %849 = vmatmul.mubr.msk.f32.gmra.mrb[14].mxu1 %vm211_vm1, %v202_v32 }
  0xe5   : > { %v805_v34 = vpop.f32.mrb[0].mxu0 }
  0xe6   : > { %v829_v35 = vpop.f32.mrb[0].mxu1  ;;  %v384_v36 = vadd.f32 %v805_v34, %v977_v33  ;;  %v378_v38 = vpop.f32.mrb[1].mxu0 }
  0xe7   : > { %v464_v37 = vadd.f32 %v829_v35, %v977_v33  ;;  %v458_v39 = vpop.f32.mrb[1].mxu1  ;;  %v379_v40 = vadd.f32 %v977_v33, %v378_v38 }
  0xe8   : > { %v459_v41 = vadd.f32 %v977_v33, %v458_v39  ;;  %vm538_vm3 = vcmp.ge.f32.partialorder %v384_v36, 0.0  ;;  %v570_v42 = vmul.f32 0.1, %v384_v36 }
  0xe9   : > { %vm554_vm4 = vcmp.ge.f32.partialorder %v464_v37, 0.0  ;;  %v586_v43 = vmul.f32 0.1, %v464_v37  ;;  %vm537_vm5 = vcmp.ge.f32.partialorder %v379_v40, 0.0  ;;  %v569_v44 = vmul.f32 0.1, %v379_v40 }
  0xea   : > { %vm553_vm6 = vcmp.ge.f32.partialorder %v459_v41, 0.0  ;;  %v585_v45 = vmul.f32 0.1, %v459_v41  ;;  %v602_v46 = vsel %vm538_vm3, %v384_v36, %v570_v42  ;;  %v808_v48 = vpop.f32.mrb[2].mxu0  ;;  %v832_v49 = vpop.f32.mrb[2].mxu1 }
  0xeb   : > { %v618_v47 = vsel %vm554_vm4, %v464_v37, %v586_v43  ;;  %635 = vst.msk [vmem:[%s988_s24 + $0x8] sm:$0xff] %vm633_vm2, %v602_v46  ;;  %v601_v50 = vsel %vm537_vm5, %v379_v40, %v569_v44  ;;  %v394_v52 = vadd.f32 %v808_v48, %v977_v33  ;;  %v474_v53 = vadd.f32 %v832_v49, %v977_v33  ;;  %v388_v54 = vpop.f32.mrb[3].mxu0  ;;  %v468_v55 = vpop.f32.mrb[3].mxu1 }
  0xec   : > { %651 = vst.msk [vmem:[%s988_s24 + $0x88] sm:$0xff] %vm633_vm2, %v618_v47  ;;  %v617_v51 = vsel %vm553_vm6, %v459_v41, %v585_v45  ;;  %634 = vst.msk [vmem:[%s988_s24] sm:$0xff] %vm633_vm2, %v601_v50  ;;  %v389_v56 = vadd.f32 %v977_v33, %v388_v54  ;;  %v469_v57 = vadd.f32 %v977_v33, %v468_v55 }
  0xed   : > { %650 = vst.msk [vmem:[%s988_s24 + $0x80] sm:$0xff] %vm633_vm2, %v617_v51  ;;  %vm540_vm7 = vcmp.ge.f32.partialorder %v394_v52, 0.0  ;;  %v572_v58 = vmul.f32 0.1, %v394_v52  ;;  %vm556_vm8 = vcmp.ge.f32.partialorder %v474_v53, 0.0  ;;  %v811_v0 = vpop.f32.mrb[4].mxu0 }
  0xee   : > { %v588_v59 = vmul.f32 0.1, %v474_v53  ;;  %vm539_vm9 = vcmp.ge.f32.partialorder %v389_v56, 0.0  ;;  %v571_v60 = vmul.f32 0.1, %v389_v56  ;;  %vm555_vm10 = vcmp.ge.f32.partialorder %v469_v57, 0.0 }
  0xef   : > { %v587_v61 = vmul.f32 0.1, %v469_v57  ;;  %v604_v62 = vsel %vm540_vm7, %v394_v52, %v572_v58  ;;  %v835_v1 = vpop.f32.mrb[4].mxu1  ;;  %v404_v4 = vadd.f32 %v811_v0, %v977_v33  ;;  %v398_v6 = vpop.f32.mrb[5].mxu0 }
  0xf0   : > { %v620_v63 = vsel %vm556_vm8, %v474_v53, %v588_v59  ;;  %637 = vst.msk [vmem:[%s988_s24 + $0x18] sm:$0xff] %vm633_vm2, %v604_v62  ;;  %v603_v2 = vsel %vm539_vm9, %v389_v56, %v571_v60  ;;  %v484_v5 = vadd.f32 %v835_v1, %v977_v33  ;;  %v478_v7 = vpop.f32.mrb[5].mxu1  ;;  %v399_v8 = vadd.f32 %v977_v33, %v398_v6 }
  0xf1   : > { %653 = vst.msk [vmem:[%s988_s24 + $0x98] sm:$0xff] %vm633_vm2, %v620_v63  ;;  %v619_v3 = vsel %vm555_vm10, %v469_v57, %v587_v61  ;;  %636 = vst.msk [vmem:[%s988_s24 + $0x10] sm:$0xff] %vm633_vm2, %v603_v2  ;;  %v479_v9 = vadd.f32 %v977_v33, %v478_v7  ;;  %v814_v10 = vpop.f32.mrb[6].mxu0  ;;  %vm542_vm11 = vcmp.ge.f32.partialorder %v404_v4, 0.0  ;;  %v574_v12 = vmul.f32 0.1, %v404_v4 }
  0xf2   : > { %652 = vst.msk [vmem:[%s988_s24 + $0x90] sm:$0xff] %vm633_vm2, %v619_v3  ;;  %v838_v11 = vpop.f32.mrb[6].mxu1  ;;  %vm558_vm12 = vcmp.ge.f32.partialorder %v484_v5, 0.0  ;;  %v590_v13 = vmul.f32 0.1, %v484_v5  ;;  %vm541_vm13 = vcmp.ge.f32.partialorder %v399_v8, 0.0  ;;  %v414_v18 = vadd.f32 %v814_v10, %v977_v33 }
  0xf3   : > { %v573_v14 = vmul.f32 0.1, %v399_v8  ;;  %vm557_vm14 = vcmp.ge.f32.partialorder %v479_v9, 0.0  ;;  %v589_v15 = vmul.f32 0.1, %v479_v9  ;;  %v606_v16 = vsel %vm542_vm11, %v404_v4, %v574_v12  ;;  %v408_v20 = vpop.f32.mrb[7].mxu0 }
  0xf4   : > { %v622_v17 = vsel %vm558_vm12, %v484_v5, %v590_v13  ;;  %v494_v19 = vadd.f32 %v838_v11, %v977_v33  ;;  %v488_v21 = vpop.f32.mrb[7].mxu1  ;;  %639 = vst.msk [vmem:[%s988_s24 + $0x28] sm:$0xff] %vm633_vm2, %v606_v16  ;;  %v409_v24 = vadd.f32 %v977_v33, %v408_v20  ;;  %vm544_vm15 = vcmp.ge.f32.partialorder %v414_v18, 0.0 }
  0xf5   : > { %655 = vst.msk [vmem:[%s988_s24 + $0xa8] sm:$0xff] %vm633_vm2, %v622_v17  ;;  %v605_v22 = vsel %vm541_vm13, %v399_v8, %v573_v14  ;;  %v621_v23 = vsel %vm557_vm14, %v479_v9, %v589_v15  ;;  %v489_v25 = vadd.f32 %v977_v33, %v488_v21  ;;  %v817_v26 = vpop.f32.mrb[8].mxu0  ;;  %v576_v28 = vmul.f32 0.1, %v414_v18 }
  0xf6   : > { %v841_v27 = vpop.f32.mrb[8].mxu1  ;;  %638 = vst.msk [vmem:[%s988_s24 + $0x20] sm:$0xff] %vm633_vm2, %v605_v22  ;;  %654 = vst.msk [vmem:[%s988_s24 + $0xa0] sm:$0xff] %vm633_vm2, %v621_v23  ;;  %vm560_vm0 = vcmp.ge.f32.partialorder %v494_v19, 0.0  ;;  %v592_v29 = vmul.f32 0.1, %v494_v19  ;;  %v424_v35 = vadd.f32 %v817_v26, %v977_v33 }
  0xf7   : > { %vm543_vm1 = vcmp.ge.f32.partialorder %v409_v24, 0.0  ;;  %v575_v30 = vmul.f32 0.1, %v409_v24  ;;  %vm559_vm3 = vcmp.ge.f32.partialorder %v489_v25, 0.0  ;;  %v591_v31 = vmul.f32 0.1, %v489_v25 }
  0xf8   : > { %v608_v32 = vsel %vm544_vm15, %v414_v18, %v576_v28  ;;  %v624_v34 = vsel %vm560_vm0, %v494_v19, %v592_v29  ;;  %v504_v36 = vadd.f32 %v841_v27, %v977_v33  ;;  %v418_v37 = vpop.f32.mrb[9].mxu0  ;;  %v498_v38 = vpop.f32.mrb[9].mxu1  ;;  %vm546_vm4 = vcmp.ge.f32.partialorder %v424_v35, 0.0 }
  0xf9   : > { %641 = vst.msk [vmem:[%s988_s24 + $0x38] sm:$0xff] %vm633_vm2, %v608_v32  ;;  %657 = vst.msk [vmem:[%s988_s24 + $0xb8] sm:$0xff] %vm633_vm2, %v624_v34  ;;  %v607_v39 = vsel %vm543_vm1, %v409_v24, %v575_v30  ;;  %v623_v40 = vsel %vm559_vm3, %v489_v25, %v591_v31  ;;  %v419_v41 = vadd.f32 %v977_v33, %v418_v37  ;;  %v820_v43 = vpop.f32.mrb[10].mxu0  ;;  %v578_v45 = vmul.f32 0.1, %v424_v35 }
  0xfa   : > { %v499_v42 = vadd.f32 %v977_v33, %v498_v38  ;;  %v844_v44 = vpop.f32.mrb[10].mxu1  ;;  %640 = vst.msk [vmem:[%s988_s24 + $0x30] sm:$0xff] %vm633_vm2, %v607_v39  ;;  %656 = vst.msk [vmem:[%s988_s24 + $0xb0] sm:$0xff] %vm633_vm2, %v623_v40  ;;  %vm562_vm5 = vcmp.ge.f32.partialorder %v504_v36, 0.0  ;;  %v594_v46 = vmul.f32 0.1, %v504_v36  ;;  %v434_v51 = vadd.f32 %v820_v43, %v977_v33 }
  0xfb   : > { %vm545_vm6 = vcmp.ge.f32.partialorder %v419_v41, 0.0  ;;  %v577_v47 = vmul.f32 0.1, %v419_v41  ;;  %v610_v49 = vsel %vm546_vm4, %v424_v35, %v578_v45  ;;  %v514_v52 = vadd.f32 %v844_v44, %v977_v33  ;;  %v428_v53 = vpop.f32.mrb[11].mxu0  ;;  %v508_v54 = vpop.f32.mrb[11].mxu1 }
  0xfc   : > { %vm561_vm7 = vcmp.ge.f32.partialorder %v499_v42, 0.0  ;;  %v593_v48 = vmul.f32 0.1, %v499_v42  ;;  %v626_v50 = vsel %vm562_vm5, %v504_v36, %v594_v46  ;;  %643 = vst.msk [vmem:[%s988_s24 + $0x48] sm:$0xff] %vm633_vm2, %v610_v49  ;;  %v429_v57 = vadd.f32 %v977_v33, %v428_v53 }
  0xfd   : > { %659 = vst.msk [vmem:[%s988_s24 + $0xc8] sm:$0xff] %vm633_vm2, %v626_v50  ;;  %v609_v55 = vsel %vm545_vm6, %v419_v41, %v577_v47  ;;  %v509_v58 = vadd.f32 %v977_v33, %v508_v54  ;;  %v823_v59 = vpop.f32.mrb[12].mxu0  ;;  %vm548_vm8 = vcmp.ge.f32.partialorder %v434_v51, 0.0  ;;  %v580_v61 = vmul.f32 0.1, %v434_v51 }
  0xfe   : > { %v625_v56 = vsel %vm561_vm7, %v499_v42, %v593_v48  ;;  %v847_v60 = vpop.f32.mrb[12].mxu1  ;;  %642 = vst.msk [vmem:[%s988_s24 + $0x40] sm:$0xff] %vm633_vm2, %v609_v55  ;;  %vm564_vm9 = vcmp.ge.f32.partialorder %v514_v52, 0.0  ;;  %v596_v62 = vmul.f32 0.1, %v514_v52  ;;  %vm547_vm10 = vcmp.ge.f32.partialorder %v429_v57, 0.0 }
  0xff   : > { %658 = vst.msk [vmem:[%s988_s24 + $0xc0] sm:$0xff] %vm633_vm2, %v625_v56  ;;  %v579_v63 = vmul.f32 0.1, %v429_v57  ;;  %vm563_vm11 = vcmp.ge.f32.partialorder %v509_v58, 0.0  ;;  %v595_v0 = vmul.f32 0.1, %v509_v58  ;;  %v612_v1 = vsel %vm548_vm8, %v434_v51, %v580_v61 }
 0x100   : > { %v628_v2 = vsel %vm564_vm9, %v514_v52, %v596_v62  ;;  %v444_v3 = vadd.f32 %v823_v59, %v977_v33  ;;  %v524_v4 = vadd.f32 %v847_v60, %v977_v33  ;;  %v438_v5 = vpop.f32.mrb[13].mxu0  ;;  %v518_v6 = vpop.f32.mrb[13].mxu1  ;;  %645 = vst.msk [vmem:[%s988_s24 + $0x58] sm:$0xff] %vm633_vm2, %v612_v1 }
 0x101   : > { %661 = vst.msk [vmem:[%s988_s24 + $0xd8] sm:$0xff] %vm633_vm2, %v628_v2  ;;  %v611_v7 = vsel %vm547_vm10, %v429_v57, %v579_v63  ;;  %v627_v8 = vsel %vm563_vm11, %v509_v58, %v595_v0  ;;  %v439_v9 = vadd.f32 %v977_v33, %v438_v5  ;;  %v519_v10 = vadd.f32 %v977_v33, %v518_v6  ;;  %v826_v11 = vpop.f32.mrb[14].mxu0 }
 0x102   : > { %v850_v12 = vpop.f32.mrb[14].mxu1  ;;  %644 = vst.msk [vmem:[%s988_s24 + $0x50] sm:$0xff] %vm633_vm2, %v611_v7  ;;  %660 = vst.msk [vmem:[%s988_s24 + $0xd0] sm:$0xff] %vm633_vm2, %v627_v8  ;;  %vm550_vm12 = vcmp.ge.f32.partialorder %v444_v3, 0.0  ;;  %v582_v13 = vmul.f32 0.1, %v444_v3  ;;  %v454_v19 = vadd.f32 %v826_v11, %v977_v33 }
 0x103   : > { %vm566_vm13 = vcmp.ge.f32.partialorder %v524_v4, 0.0  ;;  %v598_v14 = vmul.f32 0.1, %v524_v4  ;;  %vm549_vm14 = vcmp.ge.f32.partialorder %v439_v9, 0.0  ;;  %v581_v15 = vmul.f32 0.1, %v439_v9 }
 0x104   : > { %vm565_vm15 = vcmp.ge.f32.partialorder %v519_v10, 0.0  ;;  %v597_v16 = vmul.f32 0.1, %v519_v10  ;;  %v614_v17 = vsel %vm550_vm12, %v444_v3, %v582_v13  ;;  %v534_v20 = vadd.f32 %v850_v12, %v977_v33  ;;  %v448_v21 = vpop.f32.mrb[15].mxu0  ;;  %v528_v22 = vpop.f32.mrb[15].mxu1 }
 0x105   : > { %v630_v18 = vsel %vm566_vm13, %v524_v4, %v598_v14  ;;  %647 = vst.msk [vmem:[%s988_s24 + $0x68] sm:$0xff] %vm633_vm2, %v614_v17  ;;  %v613_v23 = vsel %vm549_vm14, %v439_v9, %v581_v15  ;;  %v449_v25 = vadd.f32 %v977_v33, %v448_v21  ;;  %v529_v26 = vadd.f32 %v977_v33, %v528_v22 }
 0x106   : > { %663 = vst.msk [vmem:[%s988_s24 + $0xe8] sm:$0xff] %vm633_vm2, %v630_v18  ;;  %v629_v24 = vsel %vm565_vm15, %v519_v10, %v597_v16  ;;  %646 = vst.msk [vmem:[%s988_s24 + $0x60] sm:$0xff] %vm633_vm2, %v613_v23  ;;  %vm552_vm0 = vcmp.ge.f32.partialorder %v454_v19, 0.0  ;;  %v584_v27 = vmul.f32 0.1, %v454_v19  ;;  %vm568_vm1 = vcmp.ge.f32.partialorder %v534_v20, 0.0 }
 0x107   : > { %662 = vst.msk [vmem:[%s988_s24 + $0xe0] sm:$0xff] %vm633_vm2, %v629_v24  ;;  %v600_v28 = vmul.f32 0.1, %v534_v20  ;;  %vm551_vm3 = vcmp.ge.f32.partialorder %v449_v25, 0.0  ;;  %v583_v29 = vmul.f32 0.1, %v449_v25 }
 0x108   : > { %vm567_vm4 = vcmp.ge.f32.partialorder %v529_v26, 0.0  ;;  %v599_v30 = vmul.f32 0.1, %v529_v26  ;;  %v616_v31 = vsel %vm552_vm0, %v454_v19, %v584_v27 }
 0x109   : > { %v632_v32 = vsel %vm568_vm1, %v534_v20, %v600_v28  ;;  %649 = vst.msk [vmem:[%s988_s24 + $0x78] sm:$0xff] %vm633_vm2, %v616_v31  ;;  %v615_v33 = vsel %vm551_vm3, %v449_v25, %v583_v29 }
 0x10a   : > { %665 = vst.msk [vmem:[%s988_s24 + $0xf8] sm:$0xff] %vm633_vm2, %v632_v32  ;;  %v631_v34 = vsel %vm567_vm4, %v529_v26, %v599_v30  ;;  %648 = vst.msk [vmem:[%s988_s24 + $0x70] sm:$0xff] %vm633_vm2, %v615_v33 }
 0x10b   : > { %664 = vst.msk [vmem:[%s988_s24 + $0xf0] sm:$0xff] %vm633_vm2, %v631_v34 }
 0x10c PF: > { %s13_s12 = sadd.s32 1, %s867_s12  }
 0x10d   : > { %p10_p4 = scmp.ge.s32.totalorder %s13_s12, 4  }
 0x10f   :  { %12 = sbr.rel (!%p10_p4) target bundleno = 1 (0x1), region = 62 }

</bundles_post_ra>
